<compile_context>
chip_gen: v7x
topology: tpu7x:2x2x1
jax: 0.10.0
libtpu: 0.0.40
codegen_flags: <defaults>
</compile_context>

<pallas_src>
import jax
import jax.numpy as jnp
from jax.experimental import pallas as pl
from jax.experimental.pallas import tpu as pltpu


# ----------------------------- Pallas kernels --------------------------------
def _conv1x1_bn_relu_mxu_kernel(wm_ref, wn_ref, b_ref, xm_ref, xn_ref, o_ref):
    # Split 1x1 conv (channel concat fused away):
    #   out(C_out, ts) = W_m(C_out, n_fi) @ x_m(n_fi, ts) + W_n @ x_n + bias
    acc = jnp.dot(wm_ref[...], xm_ref[...], preferred_element_type=jnp.float32)
    acc = acc + jnp.dot(wn_ref[...], xn_ref[...], preferred_element_type=jnp.float32)
    o_ref[...] = jnp.maximum(acc + b_ref[...], 0.0).astype(o_ref.dtype)


def _conv1x1_bn_relu_vpu_kernel(wm_ref, wn_ref, b_ref, xm_ref, xn_ref, o_ref):
    # Tiny channel counts: keep spatial on the 128 lanes and do C_in
    # broadcast-FMAs on the VPU.  All math in f32 (v5e has no bf16 VPU path).
    c_out, ts = o_ref.shape
    wm = wm_ref[...].astype(jnp.float32)          # (C_out, n_fi)
    wn = wn_ref[...].astype(jnp.float32)          # (C_out, n_fo)
    xm = xm_ref[...].astype(jnp.float32)          # (n_fi, ts)
    xn = xn_ref[...].astype(jnp.float32)          # (n_fo, ts)
    acc = jnp.zeros((c_out, ts), jnp.float32)
    for c in range(wm.shape[1]):                  # unrolled: n_fi is small/static
        acc = acc + wm[:, c:c + 1] * xm[c:c + 1, :]
    for c in range(wn.shape[1]):
        acc = acc + wn[:, c:c + 1] * xn[c:c + 1, :]
    o_ref[...] = jnp.maximum(acc + b_ref[...], 0.0).astype(o_ref.dtype)


# ------------------------------ JAX wrapper -----------------------------------
def nearest_resize_nchw(x, out_hw):
    """PyTorch F.interpolate(mode='nearest'): src = floor(dst * in / out)."""
    _, _, h_in, w_in = x.shape
    H, W = out_hw
    idx_h = (jnp.arange(H) * h_in) // H
    idx_w = (jnp.arange(W) * w_in) // W
    return x[:, :, idx_h[:, None], idx_w[None, :]]


def _pick_spatial_tile(hw, c_in, c_out, in_bytes, out_bytes,
                       budget_bytes=12 * 1024 * 1024):
    """Largest lane-dense spatial tile whose double-buffered working set fits."""
    per_lane = 2 * (c_in * in_bytes + c_out * out_bytes)   # x2: double buffering
    ts = min(hw, 8192, max(128, budget_bytes // max(per_lane, 1)))
    if ts < hw:
        ts = max(128, (ts // 128) * 128)                    # keep blocks lane-dense
    return int(ts)


def cat_adaptive_forward(f_m, f_n, w_conv, bn_scale, bn_bias, *,
                         compute_dtype=jnp.bfloat16, use_mxu=None):
    """f_m: (N, n_fi, H, W); f_n: (N, n_fo, h, w); w_conv: (n_fo, n_fi+n_fo, 1, 1)."""
    N, n_fi, H, W = f_m.shape
    n_fo = f_n.shape[1]
    C_out, C_in = w_conv.shape[0], w_conv.shape[1]
    assert C_in == n_fi + n_fo
    HW = H * W

    # Fold the eval-mode BN scale into the conv weight; bias is added in-kernel.
    w_mat = w_conv[:, :, 0, 0] * bn_scale[:, None]          # (C_out, C_in) f32
    w_m = w_mat[:, :n_fi].astype(compute_dtype)             # (C_out, n_fi)
    w_n = w_mat[:, n_fi:].astype(compute_dtype)             # (C_out, n_fo)
    bias = bn_bias.astype(jnp.float32).reshape(C_out, 1)    # f32 epilogue

    # Nearest-neighbour resize of f_n to f_m's spatial size (cast first so the
    # gather already writes the storage dtype).
    f_n_up = nearest_resize_nchw(f_n.astype(compute_dtype), (H, W))

    # NCHW kept end-to-end; flattening H*W is a free reshape (no transpose,
    # no concat).  The flattened spatial axis becomes the lane-dense dim.
    x_m = f_m.astype(compute_dtype).reshape(N, n_fi, HW)
    x_n = f_n_up.reshape(N, n_fo, HW)

    out_dtype = compute_dtype
    ts = _pick_spatial_tile(HW, C_in, C_out,
                            jnp.dtype(compute_dtype).itemsize,
                            jnp.dtype(out_dtype).itemsize)
    if use_mxu is None:
        use_mxu = max(C_in, C_out) > 16
    kernel = _conv1x1_bn_relu_mxu_kernel if use_mxu else _conv1x1_bn_relu_vpu_kernel

    y = pl.pallas_call(
        kernel,
        out_shape=jax.ShapeDtypeStruct((N, C_out, HW), out_dtype),
        grid_spec=pltpu.PrefetchScalarGridSpec(
            num_scalar_prefetch=0,
            grid=(N, pl.cdiv(HW, ts)),
            in_specs=[
                pl.BlockSpec((C_out, n_fi), lambda n, s: (0, 0)),   # W_m (resident)
                pl.BlockSpec((C_out, n_fo), lambda n, s: (0, 0)),   # W_n (resident)
                pl.BlockSpec((C_out, 1), lambda n, s: (0, 0)),      # folded BN bias
                pl.BlockSpec((None, n_fi, ts), lambda n, s: (n, 0, s)),  # f_m tile
                pl.BlockSpec((None, n_fo, ts), lambda n, s: (n, 0, s)),  # f_n_up tile
            ],
            out_specs=pl.BlockSpec((None, C_out, ts), lambda n, s: (n, 0, s)),
        ),
        compiler_params=pltpu.CompilerParams(
            dimension_semantics=("parallel", "parallel"),
            vmem_limit_bytes=32 * 1024 * 1024,
        ),
    )(w_m, w_n, bias, x_m, x_n)

    return y.reshape(N, C_out, H, W)


# ------------------------------ reference -------------------------------------
def reference_forward(f_m, f_n, w_folded, bn_bias):
    H, W = f_m.shape[2], f_m.shape[3]
    f_n_up = nearest_resize_nchw(f_n, (H, W))
    x = jnp.concatenate([f_m, f_n_up], axis=1).astype(jnp.float32)
    y = jnp.einsum('nchw,oc->nohw', x, w_folded.astype(jnp.float32),
                   precision=jax.lax.Precision.HIGHEST)
    y = y + bn_bias.astype(jnp.float32)[None, :, None, None]
    return jnp.maximum(y, 0.0)


# ------------------------------ main ------------------------------------------
if __name__ == "__main__":
    def make_params(key, n_fi, n_fo):
        k3, k4, k5 = jax.random.split(key, 3)
        C_in, C_out = n_fi + n_fo, n_fo
        limit = (6.0 / (C_in + C_out)) ** 0.5          # xavier-uniform-like
        w_conv = jax.random.uniform(k3, (C_out, C_in, 1, 1),
                                    minval=-limit, maxval=limit, dtype=jnp.float32)
        gamma = 1.0 + 0.1 * jax.random.normal(k4, (C_out,), jnp.float32)
        beta = 0.1 * jax.random.normal(k5, (C_out,), jnp.float32)
        running_mean = jnp.zeros((C_out,), jnp.float32)
        running_var = jnp.ones((C_out,), jnp.float32)
        eps = 1e-5
        bn_scale = gamma / jnp.sqrt(running_var + eps)
        bn_bias = beta - running_mean * bn_scale
        return w_conv, bn_scale, bn_bias

    fwd = jax.jit(cat_adaptive_forward, static_argnames=("compute_dtype", "use_mxu"))

    # --- Case 1: module-spec shapes (tiny channels -> VPU spatial-lane kernel) ---
    k = jax.random.split(jax.random.PRNGKey(0), 3)
    N, n_fi, n_fo, H, W, h, w = 2, 4, 4, 16, 16, 8, 8
    f_m = jax.random.normal(k[0], (N, n_fi, H, W), jnp.float32)
    f_n = jax.random.normal(k[1], (N, n_fo, h, w), jnp.float32)
    w_conv, bn_scale, bn_bias = make_params(k[2], n_fi, n_fo)
    w_folded = w_conv[:, :, 0, 0] * bn_scale[:, None]

    # exact-precision run (f32 storage + f32 compute)
    out32 = jax.block_until_ready(fwd(f_m, f_n, w_conv, bn_scale, bn_bias,
                                      compute_dtype=jnp.float32))
    ref32 = reference_forward(f_m, f_n, w_folded, bn_bias)
    assert out32.shape == (N, n_fo, H, W)
    assert jnp.allclose(out32, ref32, atol=1e-5, rtol=1e-5)

    # bandwidth-optimized bf16 run; compare against the same bf16-rounded inputs
    out16 = jax.block_until_ready(fwd(f_m, f_n, w_conv, bn_scale, bn_bias,
                                      compute_dtype=jnp.bfloat16))
    ref16 = reference_forward(f_m.astype(jnp.bfloat16), f_n.astype(jnp.bfloat16),
                              w_folded.astype(jnp.bfloat16), bn_bias)
    assert jnp.allclose(out16.astype(jnp.float32), ref16, atol=1e-2, rtol=1e-2)

    # --- Case 2: larger channels -> MXU split-matmul kernel, bf16 storage ------
    k = jax.random.split(jax.random.PRNGKey(1), 3)
    N2, n_fi2, n_fo2, H2, W2, h2, w2 = 2, 96, 32, 32, 32, 16, 16
    f_m2 = jax.random.normal(k[0], (N2, n_fi2, H2, W2), jnp.float32)
    f_n2 = jax.random.normal(k[1], (N2, n_fo2, h2, w2), jnp.float32)
    w_conv2, bn_scale2, bn_bias2 = make_params(k[2], n_fi2, n_fo2)
    w_folded2 = w_conv2[:, :, 0, 0] * bn_scale2[:, None]

    out2 = jax.block_until_ready(fwd(f_m2, f_n2, w_conv2, bn_scale2, bn_bias2,
                                     compute_dtype=jnp.bfloat16))
    ref2 = reference_forward(f_m2.astype(jnp.bfloat16), f_n2.astype(jnp.bfloat16),
                             w_folded2.astype(jnp.bfloat16), bn_bias2)
    assert out2.shape == (N2, n_fo2, H2, W2)
    assert jnp.allclose(out2.astype(jnp.float32), ref2, atol=1e-2, rtol=1e-2)

    print("KERNEL_OK")
</pallas_src>

<mosaic_0001>
module attributes {stable_mosaic.version = 11 : i64} {
  func.func @_conv1x1_bn_relu_vpu_kernel(%arg0: i32, %arg1: i32, %arg2: memref<4x4xf32, #tpu.memory_space<vmem>>, %arg3: memref<4x4xf32, #tpu.memory_space<vmem>>, %arg4: memref<4x1xf32, #tpu.memory_space<vmem>>, %arg5: memref<1x4x256xf32, #tpu.memory_space<vmem>>, %arg6: memref<1x4x256xf32, #tpu.memory_space<vmem>>, %arg7: memref<1x4x256xf32, #tpu.memory_space<vmem>>) attributes {dimension_semantics = [#tpu.dimension_semantics<parallel>, #tpu.dimension_semantics<parallel>], iteration_bounds = array<i64: 2, 1>, scalar_prefetch = 0 : i64, scratch_operands = 0 : i64, tpu.core_type = #tpu.core_type<tc>, window_params = [{pipeline_mode = #tpu.pipeline_mode<synchronous>, transform_indices = @transform_0, window_bounds = array<i64: 4, 4>}, {pipeline_mode = #tpu.pipeline_mode<synchronous>, transform_indices = @transform_1, window_bounds = array<i64: 4, 4>}, {pipeline_mode = #tpu.pipeline_mode<synchronous>, transform_indices = @transform_2, window_bounds = array<i64: 4, 1>}, {transform_indices = @transform_3, window_bounds = array<i64: 1, 4, 256>}, {transform_indices = @transform_4, window_bounds = array<i64: 1, 4, 256>}, {transform_indices = @transform_5, window_bounds = array<i64: 1, 4, 256>}]} {
    %c0 = arith.constant 0 : index
    %c0_0 = arith.constant 0 : index
    %0 = vector.load %arg2[%c0, %c0_0] : memref<4x4xf32, #tpu.memory_space<vmem>>, vector<4x4xf32>
    %c0_1 = arith.constant 0 : index
    %c0_2 = arith.constant 0 : index
    %1 = vector.load %arg3[%c0_1, %c0_2] : memref<4x4xf32, #tpu.memory_space<vmem>>, vector<4x4xf32>
    %c0_3 = arith.constant 0 : index
    %c0_4 = arith.constant 0 : index
    %c0_5 = arith.constant 0 : index
    %2 = vector.load %arg5[%c0_3, %c0_4, %c0_5] : memref<1x4x256xf32, #tpu.memory_space<vmem>>, vector<1x4x256xf32>
    %3 = vector.shape_cast %2 : vector<1x4x256xf32> to vector<4x256xf32>
    %c0_6 = arith.constant 0 : index
    %c0_7 = arith.constant 0 : index
    %c0_8 = arith.constant 0 : index
    %4 = vector.load %arg6[%c0_6, %c0_7, %c0_8] : memref<1x4x256xf32, #tpu.memory_space<vmem>>, vector<1x4x256xf32>
    %5 = vector.shape_cast %4 : vector<1x4x256xf32> to vector<4x256xf32>
    %cst = arith.constant 0.000000e+00 : f32
    %6 = vector.broadcast %cst : f32 to vector<4x256xf32>
    %7 = vector.extract_strided_slice %0 {offsets = [0, 0], sizes = [4, 1], strides = [1, 1]} : vector<4x4xf32> to vector<4x1xf32>
    %8 = vector.extract_strided_slice %3 {offsets = [0, 0], sizes = [1, 256], strides = [1, 1]} : vector<4x256xf32> to vector<1x256xf32>
    %9 = vector.broadcast %7 : vector<4x1xf32> to vector<4x256xf32>
    %10 = vector.broadcast %8 : vector<1x256xf32> to vector<4x256xf32>
    %11 = arith.mulf %9, %10 : vector<4x256xf32>
    %12 = arith.addf %6, %11 : vector<4x256xf32>
    %13 = vector.extract_strided_slice %0 {offsets = [0, 1], sizes = [4, 1], strides = [1, 1]} : vector<4x4xf32> to vector<4x1xf32>
    %14 = vector.extract_strided_slice %3 {offsets = [1, 0], sizes = [1, 256], strides = [1, 1]} : vector<4x256xf32> to vector<1x256xf32>
    %15 = vector.broadcast %13 : vector<4x1xf32> to vector<4x256xf32>
    %16 = vector.broadcast %14 : vector<1x256xf32> to vector<4x256xf32>
    %17 = arith.mulf %15, %16 : vector<4x256xf32>
    %18 = arith.addf %12, %17 : vector<4x256xf32>
    %19 = vector.extract_strided_slice %0 {offsets = [0, 2], sizes = [4, 1], strides = [1, 1]} : vector<4x4xf32> to vector<4x1xf32>
    %20 = vector.extract_strided_slice %3 {offsets = [2, 0], sizes = [1, 256], strides = [1, 1]} : vector<4x256xf32> to vector<1x256xf32>
    %21 = vector.broadcast %19 : vector<4x1xf32> to vector<4x256xf32>
    %22 = vector.broadcast %20 : vector<1x256xf32> to vector<4x256xf32>
    %23 = arith.mulf %21, %22 : vector<4x256xf32>
    %24 = arith.addf %18, %23 : vector<4x256xf32>
    %25 = vector.extract_strided_slice %0 {offsets = [0, 3], sizes = [4, 1], strides = [1, 1]} : vector<4x4xf32> to vector<4x1xf32>
    %26 = vector.extract_strided_slice %3 {offsets = [3, 0], sizes = [1, 256], strides = [1, 1]} : vector<4x256xf32> to vector<1x256xf32>
    %27 = vector.broadcast %25 : vector<4x1xf32> to vector<4x256xf32>
    %28 = vector.broadcast %26 : vector<1x256xf32> to vector<4x256xf32>
    %29 = arith.mulf %27, %28 : vector<4x256xf32>
    %30 = arith.addf %24, %29 : vector<4x256xf32>
    %31 = vector.extract_strided_slice %1 {offsets = [0, 0], sizes = [4, 1], strides = [1, 1]} : vector<4x4xf32> to vector<4x1xf32>
    %32 = vector.extract_strided_slice %5 {offsets = [0, 0], sizes = [1, 256], strides = [1, 1]} : vector<4x256xf32> to vector<1x256xf32>
    %33 = vector.broadcast %31 : vector<4x1xf32> to vector<4x256xf32>
    %34 = vector.broadcast %32 : vector<1x256xf32> to vector<4x256xf32>
    %35 = arith.mulf %33, %34 : vector<4x256xf32>
    %36 = arith.addf %30, %35 : vector<4x256xf32>
    %37 = vector.extract_strided_slice %1 {offsets = [0, 1], sizes = [4, 1], strides = [1, 1]} : vector<4x4xf32> to vector<4x1xf32>
    %38 = vector.extract_strided_slice %5 {offsets = [1, 0], sizes = [1, 256], strides = [1, 1]} : vector<4x256xf32> to vector<1x256xf32>
    %39 = vector.broadcast %37 : vector<4x1xf32> to vector<4x256xf32>
    %40 = vector.broadcast %38 : vector<1x256xf32> to vector<4x256xf32>
    %41 = arith.mulf %39, %40 : vector<4x256xf32>
    %42 = arith.addf %36, %41 : vector<4x256xf32>
    %43 = vector.extract_strided_slice %1 {offsets = [0, 2], sizes = [4, 1], strides = [1, 1]} : vector<4x4xf32> to vector<4x1xf32>
    %44 = vector.extract_strided_slice %5 {offsets = [2, 0], sizes = [1, 256], strides = [1, 1]} : vector<4x256xf32> to vector<1x256xf32>
    %45 = vector.broadcast %43 : vector<4x1xf32> to vector<4x256xf32>
    %46 = vector.broadcast %44 : vector<1x256xf32> to vector<4x256xf32>
    %47 = arith.mulf %45, %46 : vector<4x256xf32>
    %48 = arith.addf %42, %47 : vector<4x256xf32>
    %49 = vector.extract_strided_slice %1 {offsets = [0, 3], sizes = [4, 1], strides = [1, 1]} : vector<4x4xf32> to vector<4x1xf32>
    %50 = vector.extract_strided_slice %5 {offsets = [3, 0], sizes = [1, 256], strides = [1, 1]} : vector<4x256xf32> to vector<1x256xf32>
    %51 = vector.broadcast %49 : vector<4x1xf32> to vector<4x256xf32>
    %52 = vector.broadcast %50 : vector<1x256xf32> to vector<4x256xf32>
    %53 = arith.mulf %51, %52 : vector<4x256xf32>
    %54 = arith.addf %48, %53 : vector<4x256xf32>
    %c0_9 = arith.constant 0 : index
    %c0_10 = arith.constant 0 : index
    %55 = vector.load %arg4[%c0_9, %c0_10] : memref<4x1xf32, #tpu.memory_space<vmem>>, vector<4x1xf32>
    %56 = vector.broadcast %55 : vector<4x1xf32> to vector<4x256xf32>
    %57 = arith.addf %54, %56 : vector<4x256xf32>
    %cst_11 = arith.constant 0.000000e+00 : f32
    %58 = vector.broadcast %cst_11 : f32 to vector<4x256xf32>
    %59 = arith.maximumf %57, %58 : vector<4x256xf32>
    %c0_12 = arith.constant 0 : index
    %c0_13 = arith.constant 0 : index
    %c0_14 = arith.constant 0 : index
    %60 = vector.load %arg7[%c0_12, %c0_13, %c0_14] : memref<1x4x256xf32, #tpu.memory_space<vmem>>, vector<1x4x256xf32>
    %61 = vector.shape_cast %60 : vector<1x4x256xf32> to vector<4x256xf32>
    %62 = vector.shape_cast %59 : vector<4x256xf32> to vector<1x4x256xf32>
    tpu.vector_store %arg7[%c0_12, %c0_13, %c0_14], %62 {strides = array<i32>} : memref<1x4x256xf32, #tpu.memory_space<vmem>>, vector<1x4x256xf32>,
    return
  }
  func.func @transform_0(%arg0: i32, %arg1: i32) -> (i32, i32) {
    %c0_i32 = arith.constant 0 : i32
    %c0_i32_0 = arith.constant 0 : i32
    %c0_i32_1 = arith.constant 0 : i32
    return %c0_i32, %c0_i32_0 : i32, i32
  }
  func.func @transform_1(%arg0: i32, %arg1: i32) -> (i32, i32) {
    %c0_i32 = arith.constant 0 : i32
    %c0_i32_0 = arith.constant 0 : i32
    %c0_i32_1 = arith.constant 0 : i32
    return %c0_i32, %c0_i32_0 : i32, i32
  }
  func.func @transform_2(%arg0: i32, %arg1: i32) -> (i32, i32) {
    %c0_i32 = arith.constant 0 : i32
    %c0_i32_0 = arith.constant 0 : i32
    %c0_i32_1 = arith.constant 0 : i32
    return %c0_i32, %c0_i32_0 : i32, i32
  }
  func.func @transform_3(%arg0: i32, %arg1: i32) -> (i32, i32, i32) {
    %c0_i32 = arith.constant 0 : i32
    %c0_i32_0 = arith.constant 0 : i32
    return %arg0, %c0_i32, %arg1 : i32, i32, i32
  }
  func.func @transform_4(%arg0: i32, %arg1: i32) -> (i32, i32, i32) {
    %c0_i32 = arith.constant 0 : i32
    %c0_i32_0 = arith.constant 0 : i32
    return %arg0, %c0_i32, %arg1 : i32, i32, i32
  }
  func.func @transform_5(%arg0: i32, %arg1: i32) -> (i32, i32, i32) {
    %c0_i32 = arith.constant 0 : i32
    %c0_i32_0 = arith.constant 0 : i32
    return %arg0, %c0_i32, %arg1 : i32, i32, i32
  }
}

</mosaic_0001>

<bundles_post_ra>
// kernel: cat_adaptive_forward.1
= control target key start
LH: loop header
LB: loop body
LE: loop exit
PB: predicated region body
PF: predicated region fallthrough
CT: control target
= control target key end

     0   :  { %s747_s18 = smov 0   ;;  %s749_s19 = smov 0   ;;  %s825_s0 = inlined_call_operand.vmem [shape: f32[4,4], index: 0, kind: input, shape index: {}]   ;;  %s826_s1 = inlined_call_operand.vmem [shape: f32[4,4], index: 1, kind: input, shape index: {}]   ;;  %s827_s2 = inlined_call_operand.vmem [shape: f32[4,1], index: 2, kind: input, shape index: {}]   ;;  %s828_s3 = inlined_call_operand.vmem [shape: f32[2,4,256], index: 3, kind: input, shape index: {}]   ;;  %s829_s4 = inlined_call_operand.vmem [shape: f32[2,4,256], index: 4, kind: input, shape index: {}]   ;;  %s830_s5 = inlined_call_operand.vmem [shape: f32[2,4,256], index: 5, kind: output, shape index: {}]  }
   0x1   :  { %s751_s20 = smov 0  }
   0x2 LB: > { %s27_s21 = sadd.s32 1, %s707_s19  ;;  %p640_p0 = scmp.ge.s32.totalorder %s711_s20, 1  ;;  %s711_s20 = sphi %s751_s20, %s15_s20   ;;  %s707_s19 = sphi %s749_s19, %s832_s19   ;;  %s703_s18 = sphi %s747_s18, %s831_s18  }
   0x3   : > { %p29_p1 = scmp.ge.s32.totalorder %s27_s21, 2  ;;  %p225_p2 = scmp.lt.s32.totalorder %s711_s20, 3 }
   0x5   : > { %s834_s21 = smov (%p29_p1, %s27_s21), 0  ;;  %p226_p3 = pnand %p640_p0, %p225_p2 }
   0x6   : > { %v300_v0 = vld [vmem:[%s825_s0] sm:$0xf] (!%p226_p3)  ;;  %v713_v1 = vmov (!%p226_p3), 2   ;;  %v714_v2 = vmov (!%p226_p3), 0   ;;  %v715_v3 = vmov (!%p226_p3), 3   ;;  %v716_v4 = vmov (!%p226_p3), 1  }
   0x7   : > { %229 = sbr.rel (%p226_p3) target bundleno = 164 (0xa4), region = 40  ;;  %682 = vset.pattern.permute.xlu1 (!%p226_p3), %v713_v1  ;;  %680 = vset.pattern.permute.xlu0 (!%p226_p3), %v714_v2  ;;  %v301_v5 = vld [vmem:[%s826_s1] sm:$0xf] (!%p226_p3)  ;;  %p271_p4 = scmp.lt.s32.totalorder (!%p226_p3), %s703_s18, 1  ;;  %v310_v7 = vlaneseq (!%p226_p3) }
   0x8   : > { %359 = vperm.xlu1 (!%p226_p3), %682, %v300_v0   ;;  %306 = vperm.xlu0 (!%p226_p3), %680, %v300_v0   ;;  %v516_v6 = vld [vmem:[%s827_s2] sm:$0xf] (!%p226_p3) }
   0x9   : > { %v311_v8 = vshrl.u32 (!%p226_p3), %v310_v7, 7 }
   0xb   : > { %v312_v9 = vsub.s32 (!%p226_p3), 0, %v311_v8  ;;  %v316_v10 = vsub.s32 (!%p226_p3), 4, %v311_v8  ;;  %v784_v11 = vsub.s32 (!%p226_p3), 1, %v311_v8  ;;  %v342_v12 = vsub.s32 (!%p226_p3), 5, %v311_v8 }
   0xc   : > { %683 = vset.pattern.permute.xlu1 (!%p226_p3), %v715_v3  ;;  %681 = vset.pattern.permute.xlu0 (!%p226_p3), %v716_v4  ;;  %v786_v14 = vsub.s32 (!%p226_p3), 2, %v311_v8  ;;  %v368_v15 = vsub.s32 (!%p226_p3), 6, %v311_v8  ;;  %v788_v16 = vsub.s32 (!%p226_p3), 3, %v311_v8  ;;  %v394_v17 = vsub.s32 (!%p226_p3), 7, %v311_v8 }
   0xd   : > { %385 = vperm.xlu1 (!%p226_p3), %683, %v300_v0   ;;  %333 = vperm.xlu0 (!%p226_p3), %681, %v300_v0  }
   0xe   : > { %s836_s18 = smov (!%p271_p4, %s703_s18), 1 }
   0xf   : > { %s778_s28 = sshll.u32 %s836_s18, 3 }
  0x10   : > { %s278_s6 = scalar_lea.vmem %s828_s3, %s778_s28  ;;  %s288_s9 = scalar_lea.vmem %s829_s4, %s778_s28 }
  0x11   : > { %684 = vset.pattern.permute.xlu1 %v714_v2  ;;  %439 = vperm.xlu0 %681, %v301_v5   ;;  %v302_v13 = vld [vmem:[%s278_s6] sm:$0xff]  ;;  %s298_s12 = scalar_lea.vmem %s830_s5, %s778_s28 }
  0x12   : > { %412 = vperm.xlu1 %684, %v301_v5   ;;  %v313_v18 = vrot.slane %v302_v13, %v312_v9  ;;  %v317_v19 = vrot.slane %v302_v13, %v316_v10  ;;  %v339_v20 = vrot.slane %v302_v13, %v784_v11  ;;  %v343_v21 = vrot.slane %v302_v13, %v342_v12  ;;  %v303_v28 = vld [vmem:[%s288_s9] sm:$0xff] }
  0x13   : > { %v365_v23 = vrot.slane %v302_v13, %v786_v14  ;;  %v369_v24 = vrot.slane %v302_v13, %v368_v15  ;;  %v391_v26 = vrot.slane %v302_v13, %v788_v16  ;;  %v395_v27 = vrot.slane %v302_v13, %v394_v17 }
  0x14   : > { %v323_v29 = vrot.slane %v313_v18, %v312_v9  ;;  %v327_v30 = vrot.slane %v317_v19, %v312_v9  ;;  %v349_v31 = vrot.slane %v339_v20, %v784_v11  ;;  %v353_v32 = vrot.slane %v343_v21, %v784_v11 }
  0x15   : > { %686 = vset.pattern.permute.xlu0 %v715_v3  ;;  %v419_v33 = vrot.slane %v303_v28, %v312_v9  ;;  %v423_v34 = vrot.slane %v303_v28, %v316_v10  ;;  %v375_v35 = vrot.slane %v365_v23, %v786_v14  ;;  %v379_v36 = vrot.slane %v369_v24, %v786_v14 }
  0x16   : > { %685 = vset.pattern.permute.xlu1 %v713_v1  ;;  %491 = vperm.xlu0 %686, %v301_v5   ;;  %v401_v37 = vrot.slane %v391_v26, %v788_v16  ;;  %v405_v38 = vrot.slane %v395_v27, %v788_v16  ;;  %v445_v41 = vrot.slane %v303_v28, %v784_v11 }
  0x17   : > { %465 = vperm.xlu1 %685, %v301_v5   ;;  %v449_v42 = vrot.slane %v303_v28, %v342_v12  ;;  %v471_v43 = vrot.slane %v303_v28, %v786_v14  ;;  %v475_v44 = vrot.slane %v303_v28, %v368_v15  ;;  %v429_v49 = vrot.slane %v419_v33, %v312_v9 }
  0x18   : > { %v433_v50 = vrot.slane %v423_v34, %v312_v9  ;;  %v497_v51 = vrot.slane %v303_v28, %v788_v16  ;;  %v501_v52 = vrot.slane %v303_v28, %v394_v17  ;;  %v455_v57 = vrot.slane %v445_v41, %v784_v11 }
  0x19   : > { %v459_v58 = vrot.slane %v449_v42, %v784_v11  ;;  %v481_v7 = vrot.slane %v471_v43, %v786_v14  ;;  %v485_v8 = vrot.slane %v475_v44, %v786_v14 }
  0x1a   : > { %688 = vset.pattern.permute.xlu0 %v714_v2  ;;  %v507_v3 = vrot.slane %v497_v51, %v788_v16  ;;  %v511_v4 = vrot.slane %v501_v52, %v788_v16 }
  0x1b   : > { %687 = vset.pattern.permute.xlu1 %v714_v2 }
  0x1c   : > { %519 = vperm.xlu1 %687, %v516_v6  }
  0x87   : > { %v360_v22 = vpop.permute.xlu1 %359  ;;  %v307_v25 = vpop.permute.xlu0 %306 }
  0x88   : > { %v328_v45 = vmul.f32 %v323_v29, %v307_v25  ;;  %v329_v46 = vmul.f32 %v327_v30, %v307_v25  ;;  %v380_v53 = vmul.f32 %v375_v35, %v360_v22  ;;  %v381_v54 = vmul.f32 %v379_v36, %v360_v22 }
  0x8c   : > { %v386_v39 = vpop.permute.xlu1 %385  ;;  %v334_v40 = vpop.permute.xlu0 %333 }
  0x8d   : > { %v354_v47 = vmul.f32 %v349_v31, %v334_v40  ;;  %v355_v48 = vmul.f32 %v353_v32, %v334_v40  ;;  %v406_v59 = vmul.f32 %v401_v37, %v386_v39  ;;  %v407_v60 = vmul.f32 %v405_v38, %v386_v39 }
  0x8f   : > { %v356_v55 = vadd.f32 %v354_v47, %v328_v45  ;;  %v357_v56 = vadd.f32 %v355_v48, %v329_v46 }
  0x90   : > { %v440_v63 = vpop.permute.xlu0 %439 }
  0x91   : > { %v382_v61 = vadd.f32 %v380_v53, %v356_v55  ;;  %v383_v62 = vadd.f32 %v381_v54, %v357_v56  ;;  %v413_v0 = vpop.permute.xlu1 %412  ;;  %v460_v9 = vmul.f32 %v455_v57, %v440_v63  ;;  %v461_v10 = vmul.f32 %v459_v58, %v440_v63 }
  0x92   : > { %v434_v1 = vmul.f32 %v429_v49, %v413_v0  ;;  %v435_v2 = vmul.f32 %v433_v50, %v413_v0 }
  0x93   : > { %v408_v5 = vadd.f32 %v406_v59, %v382_v61  ;;  %v409_v6 = vadd.f32 %v407_v60, %v383_v62 }
  0x95   : > { %v436_v11 = vadd.f32 %v434_v1, %v408_v5  ;;  %v437_v12 = vadd.f32 %v435_v2, %v409_v6  ;;  %v492_v13 = vpop.permute.xlu0 %491 }
  0x96   : > { %v466_v15 = vpop.permute.xlu1 %465  ;;  %v512_v17 = vmul.f32 %v507_v3, %v492_v13  ;;  %v513_v18 = vmul.f32 %v511_v4, %v492_v13 }
  0x97   : > { %v462_v19 = vadd.f32 %v460_v9, %v436_v11  ;;  %v463_v20 = vadd.f32 %v461_v10, %v437_v12  ;;  %v486_v21 = vmul.f32 %v481_v7, %v466_v15  ;;  %v487_v22 = vmul.f32 %v485_v8, %v466_v15 }
  0x99   : > { %v488_v16 = vadd.f32 %v486_v21, %v462_v19  ;;  %v489_v23 = vadd.f32 %v487_v22, %v463_v20 }
  0x9b   : > { %v520_v24 = vpop.permute.xlu1 %519  ;;  %v514_v25 = vadd.f32 %v512_v17, %v488_v16  ;;  %v515_v26 = vadd.f32 %v513_v18, %v489_v23 }
  0x9d   : > { %v522_v27 = vadd.f32 %v520_v24, %v514_v25  ;;  %v523_v14 = vadd.f32 %v520_v24, %v515_v26 }
  0x9f   : > { %v524_v28 = vmax.f32 %v522_v27, 0.0  ;;  %v525_v29 = vmax.f32 %v523_v14, 0.0 }
  0xa1   : > { %v528_v30 = vcombine.low %v524_v28, %v525_v29 }
  0xa3   : > { %530 = vst [vmem:[%s298_s12] sm:$0xff] %v528_v30 }
  0xa4 PF: > { %s15_s20 = sadd.s32 1, %s711_s20   ;;  %s831_s18 = smov %s707_s19 }
  0xa5   : > { %p12_p5 = scmp.ge.s32.totalorder %s15_s20, 4   ;;  %s832_s19 = smov %s834_s21 }
  0xa7   :  { %14 = sbr.rel (!%p12_p5) target bundleno = 2 (0x2), region = 73 }

</bundles_post_ra>
